<compile_context>
chip_gen: v5e
topology: v5e:2x2
jax: 0.10.0
libtpu: 0.0.40
codegen_flags: <defaults>
</compile_context>

<pallas_src>
import inspect

import jax
import jax.numpy as jnp
from jax.experimental import pallas as pl
from jax.experimental.pallas import tpu as pltpu

_LANE = 128
_SUBLANE = 16                 # bf16 sublane packing for the activation scratch
_STEP_OVERHEAD_ROWS = 64      # proxy for ~0.35us per-grid-step overhead


def _round_up(v, m):
    return (v + m - 1) // m * m


def _has_pipeline_mode():
    try:
        return ("pipeline_mode" in inspect.signature(pl.BlockSpec).parameters
                and hasattr(pl, "Buffered"))
    except (TypeError, ValueError):
        return False


_HAS_PIPELINE_MODE = _has_pipeline_mode()


def _vmem_capacity_bytes():
    """Physical per-core VMEM (128 MiB v5e/v6e, 64 MiB v7x); conservative fallback."""
    try:
        info = pltpu.get_tpu_info()
        for name in ("vmem_capacity_bytes", "vmem_size_bytes", "vmem_bytes"):
            cap = getattr(info, name, None)
            if cap:
                return int(cap)
    except Exception:
        pass
    return 64 << 20  # smallest per-core VMEM across supported generations


# ---------------------------------------------------------------------------
# Kernel
# ---------------------------------------------------------------------------
def _mlp_kernel(x_ref, w1_ref, b1_ref, w2_ref, b2_ref, o_ref, h_ref):
    # fc1 + ReLU once per batch tile. The class axis (grid axis 1) is inner, so
    # the bf16 activation stays resident in VMEM scratch across all C tiles.
    @pl.when(pl.program_id(1) == 0)
    def _():
        # x arrives f32 straight from HBM; the VPU cast to bf16 hides under the
        # MXU pass (no wrapper-side cast / extra HBM pass over x).
        x = x_ref[...].astype(jnp.bfloat16)
        h = jnp.dot(x, w1_ref[...], preferred_element_type=jnp.float32)
        h = jnp.maximum(h + b1_ref[...], 0.0)  # bias + ReLU in f32
        # TODO(synk): training-mode dropout (p=0.3) would use pltpu.prng_seed +
        # pltpu.prng_random_bits; eval-mode dropout is the identity, so omitted.
        h_ref[...] = h.astype(jnp.bfloat16)

    # fc2 for this (batch tile, class tile); f32 accumulation, bias after.
    out = jnp.dot(h_ref[...], w2_ref[...], preferred_element_type=jnp.float32)
    o_ref[...] = (out + b2_ref[...]).astype(o_ref.dtype)


# ---------------------------------------------------------------------------
# Tiling heuristics
# ---------------------------------------------------------------------------
def _choose_tile_b(B, max_tile_b, want_two_steps):
    """Largest batch tile (multiple of 16) minimizing padded rows + per-step
    overhead; optionally guarantees >= 2 grid steps (v7x megacore)."""
    b16 = _round_up(max(B, 1), _SUBLANE)
    cap = max(_SUBLANE, min(_round_up(max_tile_b, _SUBLANE), b16))
    min_steps = 2 if (want_two_steps and b16 >= 2 * _SUBLANE) else 1
    best_t, best_cost = cap, None
    for t in range(cap, _SUBLANE - 1, -_SUBLANE):
        Bp = _round_up(B, t)
        steps = Bp // t
        if steps < min_steps:
            continue
        cost = Bp + steps * _STEP_OVERHEAD_ROWS
        if best_cost is None or cost < best_cost:
            best_t, best_cost = t, cost
    return best_t


def _choose_tile_c(Cp, tile_b, Dp, Hp, out_bytes, budget, n_wbuf):
    """Full Cp if the resident fc2 weights fit the VMEM budget; otherwise the
    largest lane-dense divisor-of-Cp tile that fits with double-buffered W2/out."""
    fixed = (n_wbuf * (Dp * Hp * 2 + Hp * 4)   # resident W1 / b1
             + tile_b * Hp * 2                 # bf16 activation scratch
             + 2 * tile_b * Dp * 4)            # double-buffered f32 x tile
    full = n_wbuf * (Hp * Cp * 2 + Cp * 4) + 2 * tile_b * Cp * out_bytes
    if fixed + full <= budget:
        return Cp
    per_blk = 2 * (Hp * _LANE * 2 + _LANE * 4) + 2 * tile_b * _LANE * out_bytes
    n_blk = max(1, (budget - fixed) // max(per_blk, 1))
    n128 = Cp // _LANE
    g = 1
    for d in range(1, n128 + 1):        # largest divisor of n128 within budget
        if n128 % d == 0 and d <= n_blk:
            g = d
    return g * _LANE


# ---------------------------------------------------------------------------
# pallas_call builder
# ---------------------------------------------------------------------------
def _build_call(tile_b, tile_c, Bp, Dp, Hp, Cp, out_dtype, vmem_limit):
    out_bytes = jnp.dtype(out_dtype).itemsize

    def resident_spec(shape, idx):
        # Blocks whose window never changes across the grid: single-buffer them
        # so VMEM is not wasted on a useless second buffer.
        if _HAS_PIPELINE_MODE:
            return pl.BlockSpec(shape, idx, pipeline_mode=pl.Buffered(1))
        return pl.BlockSpec(shape, idx)

    w2_resident = tile_c == Cp
    w2_spec = (resident_spec((Hp, tile_c), lambda i, j: (0, j)) if w2_resident
               else pl.BlockSpec((Hp, tile_c), lambda i, j: (0, j)))
    b2_spec = (resident_spec((1, tile_c), lambda i, j: (0, j)) if w2_resident
               else pl.BlockSpec((1, tile_c), lambda i, j: (0, j)))

    cost = pl.CostEstimate(
        flops=2 * Bp * Dp * Hp + 2 * Bp * Hp * Cp,
        transcendentals=0,
        bytes_accessed=(Bp * Dp * 4 + Dp * Hp * 2 + Hp * Cp * 2
                        + Hp * 4 + Cp * 4 + Bp * Cp * out_bytes),
    )

    return pl.pallas_call(
        _mlp_kernel,
        out_shape=jax.ShapeDtypeStruct((Bp, Cp), out_dtype),
        grid=(Bp // tile_b, Cp // tile_c),
        in_specs=[
            pl.BlockSpec((tile_b, Dp), lambda i, j: (i, 0)),   # x (native f32), batch tiled
            resident_spec((Dp, Hp), lambda i, j: (0, 0)),      # W1 bf16, resident
            resident_spec((1, Hp), lambda i, j: (0, 0)),       # b1 f32, resident
            w2_spec,                                           # W2 bf16 (resident or C-tiled)
            b2_spec,                                           # b2 f32
        ],
        out_specs=pl.BlockSpec((tile_b, tile_c), lambda i, j: (i, j)),
        scratch_shapes=[pltpu.VMEM((tile_b, Hp), jnp.bfloat16)],
        compiler_params=pltpu.CompilerParams(
            # Batch axis parallel (megacore sharding on v7x). The class axis
            # reuses the fc1 activation computed at j == 0, so it stays ordered.
            dimension_semantics=("parallel", "arbitrary"),
            vmem_limit_bytes=int(vmem_limit),
        ),
        cost_estimate=cost,
    )


# ---------------------------------------------------------------------------
# Public wrappers
# ---------------------------------------------------------------------------
def prepare_params(w1, b1, w2, b2):
    """One-time weight prep: pad to lane-dense (multiple-of-128) shapes and cast
    matmul operands to bf16. Call ONCE at init and reuse per forward call, so no
    per-call HBM pass over the weights is needed."""
    D, H = w1.shape
    C = w2.shape[1]
    Dp, Hp, Cp = _round_up(D, _LANE), _round_up(H, _LANE), _round_up(C, _LANE)
    w1_p = jnp.pad(w1.astype(jnp.float32), ((0, Dp - D), (0, Hp - H))).astype(jnp.bfloat16)
    b1_p = jnp.pad(b1.astype(jnp.float32), (0, Hp - H)).reshape(1, Hp)
    w2_p = jnp.pad(w2.astype(jnp.float32), ((0, Hp - H), (0, Cp - C))).astype(jnp.bfloat16)
    b2_p = jnp.pad(b2.astype(jnp.float32), (0, Cp - C)).reshape(1, Cp)
    return {"w1": w1_p, "b1": b1_p, "w2": w2_p, "b2": b2_p,
            "dims": (D, H, C), "padded": (Dp, Hp, Cp)}


def final_classifier_forward(x, params, *, max_tile_b=None, out_dtype=None):
    """Fused fc1 -> ReLU -> (eval dropout == identity) -> fc2.

    x: [B, D] (f32 or bf16); params: output of prepare_params().
    Returns [B, C] in `out_dtype` (default: x.dtype). Pass out_dtype=bf16 to
    halve output writeback bytes when bf16 logits are acceptable downstream."""
    B, D = x.shape
    D0, H, C = params["dims"]
    assert D == D0, f"input_dim mismatch: {D} vs {D0}"
    Dp, Hp, Cp = params["padded"]
    out_dtype = x.dtype if out_dtype is None else out_dtype
    out_bytes = jnp.dtype(out_dtype).itemsize

    vmem_cap = _vmem_capacity_bytes()
    # Leave headroom for compiler-internal scratch / pipeline buffers; never
    # claim the full physical VMEM (esp. v7x's 64 MiB per core).
    budget = max(vmem_cap - (12 << 20), 32 << 20)
    if max_tile_b is None:
        max_tile_b = 512 if vmem_cap >= (96 << 20) else 256

    # Batch tile: low padding waste, >= 2 grid steps so both v7x TensorCores
    # get work under dimension_semantics=("parallel", ...).
    tile_b = _choose_tile_b(B, max_tile_b, want_two_steps=True)
    Bp = _round_up(B, tile_b)

    n_wbuf = 1 if _HAS_PIPELINE_MODE else 2
    tile_c = _choose_tile_c(Cp, tile_b, Dp, Hp, out_bytes, budget, n_wbuf)

    w2_buf = n_wbuf if tile_c == Cp else 2
    vmem_need = (2 * tile_b * Dp * 4                       # x tile (f32, double-buffered)
                 + 2 * tile_b * tile_c * out_bytes         # out tile (double-buffered)
                 + tile_b * Hp * 2                         # bf16 activation scratch
                 + n_wbuf * (Dp * Hp * 2 + Hp * 4)         # W1 / b1
                 + w2_buf * (Hp * tile_c * 2 + tile_c * 4))  # W2 / b2
    vmem_limit = min(max(int(vmem_need * 3 // 2) + (4 << 20), 32 << 20), budget)

    # x stays in its native dtype; the kernel casts per-tile (no wrapper HBM pass).
    x_p = x if (B == Bp and D == Dp) else jnp.pad(x, ((0, Bp - B), (0, Dp - D)))

    call = _build_call(tile_b, tile_c, Bp, Dp, Hp, Cp, out_dtype, vmem_limit)
    out_p = call(x_p, params["w1"], params["b1"], params["w2"], params["b2"])
    return out_p[:B, :C]


def init_params(key, input_dim, hidden_dim, num_classes, dtype=jnp.float32):
    """Deterministic init mimicking nn.Linear's uniform(-1/sqrt(fan_in), ...)."""
    k1, k2, k3, k4 = jax.random.split(key, 4)
    lim1 = 1.0 / jnp.sqrt(jnp.array(input_dim, dtype))
    lim2 = 1.0 / jnp.sqrt(jnp.array(hidden_dim, dtype))
    w1 = jax.random.uniform(k1, (input_dim, hidden_dim), dtype, -lim1, lim1)
    b1 = jax.random.uniform(k2, (hidden_dim,), dtype, -lim1, lim1)
    w2 = jax.random.uniform(k3, (hidden_dim, num_classes), dtype, -lim2, lim2)
    b2 = jax.random.uniform(k4, (num_classes,), dtype, -lim2, lim2)
    return w1, b1, w2, b2


if __name__ == "__main__":
    key = jax.random.PRNGKey(0)
    batch = 8
    input_dim = 32
    hidden_dim = 64      # module default is 512; kept small for the example
    num_classes = 16

    kx, kp = jax.random.split(key)
    x = jax.random.normal(kx, (batch, input_dim), jnp.float32)
    w1, b1, w2, b2 = init_params(kp, input_dim, hidden_dim, num_classes)

    # Weight prep happens ONCE (padding + bf16 cast hoisted out of the call path).
    params = prepare_params(w1, b1, w2, b2)

    out = final_classifier_forward(x, params)
    out = jax.block_until_ready(out)

    # Pure-JAX f32 reference (eval-mode dropout == identity). Kernel uses bf16
    # MXU operands with f32 accumulation -> compare with bf16-level tolerance.
    ref = jnp.maximum(x @ w1 + b1, 0.0) @ w2 + b2
    assert out.shape == (batch, num_classes)
    assert jnp.allclose(out, ref, atol=2e-2, rtol=2e-2), float(
        jnp.max(jnp.abs(out - ref))
    )

    print("KERNEL_OK")
</pallas_src>

<mosaic_0001>
module attributes {stable_mosaic.version = 11 : i64} {
  func.func @_mlp_kernel(%arg0: i32, %arg1: i32, %arg2: memref<16x128xf32, #tpu.memory_space<vmem>>, %arg3: memref<128x128xbf16, #tpu.memory_space<vmem>>, %arg4: memref<1x128xf32, #tpu.memory_space<vmem>>, %arg5: memref<128x128xbf16, #tpu.memory_space<vmem>>, %arg6: memref<1x128xf32, #tpu.memory_space<vmem>>, %arg7: memref<16x128xf32, #tpu.memory_space<vmem>>, %arg8: memref<16x128xbf16, #tpu.memory_space<vmem>>) attributes {dimension_semantics = [#tpu.dimension_semantics<parallel>, #tpu.dimension_semantics<arbitrary>], iteration_bounds = array<i64: 1, 1>, scalar_prefetch = 0 : i64, scratch_operands = 1 : i64, tpu.core_type = #tpu.core_type<tc>, window_params = [{transform_indices = @transform_0, window_bounds = array<i64: 16, 128>}, {pipeline_mode = #tpu.pipeline_mode<synchronous>, transform_indices = @transform_1, window_bounds = array<i64: 128, 128>}, {pipeline_mode = #tpu.pipeline_mode<synchronous>, transform_indices = @transform_2, window_bounds = array<i64: 1, 128>}, {pipeline_mode = #tpu.pipeline_mode<synchronous>, transform_indices = @transform_3, window_bounds = array<i64: 128, 128>}, {pipeline_mode = #tpu.pipeline_mode<synchronous>, transform_indices = @transform_4, window_bounds = array<i64: 1, 128>}, {transform_indices = @transform_5, window_bounds = array<i64: 16, 128>}]} {
    %c0_i32 = arith.constant 0 : i32
    %0 = arith.cmpi eq, %arg1, %c0_i32 : i32
    %1 = arith.extui %0 : i1 to i32
    %c0_i32_0 = arith.constant 0 : i32
    %2 = arith.cmpi ne, %1, %c0_i32_0 : i32
    scf.if %2 {
      %c0_8 = arith.constant 0 : index
      %c0_9 = arith.constant 0 : index
      %10 = vector.load %arg2[%c0_8, %c0_9] : memref<16x128xf32, #tpu.memory_space<vmem>>, vector<16x128xf32>
      %11 = arith.truncf %10 : vector<16x128xf32> to vector<16x128xbf16>
      %c0_10 = arith.constant 0 : index
      %c0_11 = arith.constant 0 : index
      %12 = vector.load %arg3[%c0_10, %c0_11] : memref<128x128xbf16, #tpu.memory_space<vmem>>, vector<128x128xbf16>
      %cst_12 = arith.constant dense<0.000000e+00> : vector<16x128xf32>
      %13 = tpu.matmul %11, %12, %cst_12 {dimension_numbers = #tpu.dot_dimension_numbers<[1], [0], [0], [1], [0, 0, 1, 1], [], []>} : vector<16x128xbf16>, vector<128x128xbf16>, vector<16x128xf32> -> vector<16x128xf32>
      %c0_13 = arith.constant 0 : index
      %c0_14 = arith.constant 0 : index
      %14 = vector.load %arg4[%c0_13, %c0_14] : memref<1x128xf32, #tpu.memory_space<vmem>>, vector<1x128xf32>
      %15 = vector.broadcast %14 : vector<1x128xf32> to vector<16x128xf32>
      %16 = arith.addf %13, %15 : vector<16x128xf32>
      %cst_15 = arith.constant 0.000000e+00 : f32
      %17 = vector.broadcast %cst_15 : f32 to vector<16x128xf32>
      %18 = arith.maximumf %16, %17 : vector<16x128xf32>
      %19 = arith.truncf %18 : vector<16x128xf32> to vector<16x128xbf16>
      %c0_16 = arith.constant 0 : index
      %c0_17 = arith.constant 0 : index
      %20 = vector.load %arg8[%c0_16, %c0_17] : memref<16x128xbf16, #tpu.memory_space<vmem>>, vector<16x128xbf16>
      tpu.vector_store %arg8[%c0_16, %c0_17], %19 {strides = array<i32>} : memref<16x128xbf16, #tpu.memory_space<vmem>>, vector<16x128xbf16>,
    } else {
    }
    %c0 = arith.constant 0 : index
    %c0_1 = arith.constant 0 : index
    %3 = vector.load %arg8[%c0, %c0_1] : memref<16x128xbf16, #tpu.memory_space<vmem>>, vector<16x128xbf16>
    %c0_2 = arith.constant 0 : index
    %c0_3 = arith.constant 0 : index
    %4 = vector.load %arg5[%c0_2, %c0_3] : memref<128x128xbf16, #tpu.memory_space<vmem>>, vector<128x128xbf16>
    %cst = arith.constant dense<0.000000e+00> : vector<16x128xf32>
    %5 = tpu.matmul %3, %4, %cst {dimension_numbers = #tpu.dot_dimension_numbers<[1], [0], [0], [1], [0, 0, 1, 1], [], []>} : vector<16x128xbf16>, vector<128x128xbf16>, vector<16x128xf32> -> vector<16x128xf32>
    %c0_4 = arith.constant 0 : index
    %c0_5 = arith.constant 0 : index
    %6 = vector.load %arg6[%c0_4, %c0_5] : memref<1x128xf32, #tpu.memory_space<vmem>>, vector<1x128xf32>
    %7 = vector.broadcast %6 : vector<1x128xf32> to vector<16x128xf32>
    %8 = arith.addf %5, %7 : vector<16x128xf32>
    %c0_6 = arith.constant 0 : index
    %c0_7 = arith.constant 0 : index
    %9 = vector.load %arg7[%c0_6, %c0_7] : memref<16x128xf32, #tpu.memory_space<vmem>>, vector<16x128xf32>
    tpu.vector_store %arg7[%c0_6, %c0_7], %8 {strides = array<i32>} : memref<16x128xf32, #tpu.memory_space<vmem>>, vector<16x128xf32>,
    return
  }
  func.func @transform_0(%arg0: i32, %arg1: i32) -> (i32, i32) {
    %c0_i32 = arith.constant 0 : i32
    %c0_i32_0 = arith.constant 0 : i32
    return %arg0, %c0_i32 : i32, i32
  }
  func.func @transform_1(%arg0: i32, %arg1: i32) -> (i32, i32) {
    %c0_i32 = arith.constant 0 : i32
    %c0_i32_0 = arith.constant 0 : i32
    %c0_i32_1 = arith.constant 0 : i32
    return %c0_i32, %c0_i32_0 : i32, i32
  }
  func.func @transform_2(%arg0: i32, %arg1: i32) -> (i32, i32) {
    %c0_i32 = arith.constant 0 : i32
    %c0_i32_0 = arith.constant 0 : i32
    %c0_i32_1 = arith.constant 0 : i32
    return %c0_i32, %c0_i32_0 : i32, i32
  }
  func.func @transform_3(%arg0: i32, %arg1: i32) -> (i32, i32) {
    %c0_i32 = arith.constant 0 : i32
    %c0_i32_0 = arith.constant 0 : i32
    return %c0_i32, %arg1 : i32, i32
  }
  func.func @transform_4(%arg0: i32, %arg1: i32) -> (i32, i32) {
    %c0_i32 = arith.constant 0 : i32
    %c0_i32_0 = arith.constant 0 : i32
    return %c0_i32, %arg1 : i32, i32
  }
  func.func @transform_5(%arg0: i32, %arg1: i32) -> (i32, i32) {
    %c0_i32 = arith.constant 0 : i32
    return %arg0, %arg1 : i32, i32
  }
}

</mosaic_0001>

<bundles_post_ra>
// kernel: tpu_custom_call.1
= control target key start
LH: loop header
LB: loop body
LE: loop exit
PB: predicated region body
PF: predicated region fallthrough
CT: control target
= control target key end

     0   :  { %10 = vsyncpa [#allocation4], 0  ;;  %s539_s0 = inlined_call_operand.hbm [shape: f32[16,128], index: 0, kind: input, shape index: {}]   ;;  %s540_s1 = inlined_call_operand.hbm [shape: bf16[128,128], index: 1, kind: input, shape index: {}]   ;;  %s541_s2 = inlined_call_operand.vmem [shape: f32[1,128], index: 2, kind: input, shape index: {}]   ;;  %s542_s3 = inlined_call_operand.hbm [shape: bf16[128,128], index: 3, kind: input, shape index: {}]   ;;  %s543_s4 = inlined_call_operand.vmem [shape: f32[1,128], index: 4, kind: input, shape index: {}]   ;;  %s544_s5 = inlined_call_operand.hbm [shape: f32[16,128], index: 5, kind: output, shape index: {}]  }
   0x1   :  { %11 = vsyncpa [#allocation7], 0  ;;  %s30_s20 = sshll.u32 %s540_s1, 4  ;;  %s31_s20 = int_to_ptr.hbm [resolvable:$true] %s30_s20 }
   0x2   :  { %12 = vsyncpa [#allocation5], 0  ;;  %s477_s21 = smov [#allocation6]   ;;  %s17_s25 = sshll.u32 %s539_s0, 4  ;;  %s18_s25 = int_to_ptr.hbm [resolvable:$true] %s17_s25 }
   0x3   :  { %s32_s22 = sshll.u32 %s477_s21, 4  ;;  %s478_s26 = smov 64   ;;  %s33_s22 = int_to_ptr.vmem [resolvable:$true] %s32_s22 }
   0x4   :  { %s479_s27 = smov 4   ;;  %s480_s28 = smov [#allocation3]  }
   0x5   :  { %38 = dma.hbm_to_vmem [thread:$0]  %s31_s20, 1024, %s33_s22, [#allocation7], %s478_s26, %s478_s26, %s479_s27  }
   0x6   :  { %s19_s29 = sshll.u32 %s480_s28, 4  ;;  %s481_s30 = smov 128   ;;  %s20_s29 = int_to_ptr.vmem [resolvable:$true] %s19_s29 }
   0x7   :  { %s482_s6 = smov 8   ;;  %s45_s8 = sshll.u32 %s542_s3, 4  ;;  %s46_s8 = int_to_ptr.hbm [resolvable:$true] %s45_s8 }
   0x8   :  { %25 = dma.hbm_to_vmem [thread:$0]  %s18_s25, 256, %s20_s29, [#allocation4], %s481_s30, %s481_s30, %s482_s6  }
   0x9   :  { %s483_s9 = smov [#allocation8]  }
   0xa   :  { %s47_s0 = sshll.u32 %s483_s9, 4  ;;  %s48_s0 = int_to_ptr.vmem [resolvable:$true] %s47_s0 }
   0xb   :  { %53 = dma.hbm_to_vmem [thread:$0]  %s46_s8, 1024, %s48_s0, [#allocation7], %s478_s26, %s478_s26, %s479_s27  }
   0xc   :  { %471 = dma.done.wait [#allocation4], 256  }
   0xd   :  { %472 = vsyncadd [#allocation4], 4294967040 }
   0xe   :  { %473 = dma.done.wait [#allocation7], 2048  }
   0xf   :  { %474 = vsyncadd [#allocation7], 4294965248  ;;  %v350_v0 = vld [vmem:[#allocation6 + $0x38] sm:$0xff]  ;;  %v349_v1 = vld [vmem:[#allocation6 + $0x30] sm:$0xff]  ;;  %s484_s13 = smov [#allocation9]   ;;  %s261_s16 = sshll.u32 %s544_s5, 4  ;;  %s262_s16 = int_to_ptr.hbm [resolvable:$true] %s261_s16 }
  0x10   :  { %143 = vmatpush.bf16.msra.mxu0 %v350_v0  ;;  %v359_v2 = vld [vmem:[#allocation8 + $0x38] sm:$0xff]  ;;  %v358_v3 = vld [vmem:[#allocation8 + $0x30] sm:$0xff]  ;;  %v348_v4 = vld [vmem:[#allocation6 + $0x28] sm:$0xff]  ;;  %s259_s14 = sshll.u32 %s484_s13, 4  ;;  %s260_s14 = int_to_ptr.vmem [resolvable:$true] %s259_s14 }
  0x11   :  { %239 = vmatpush.bf16.msra.mxu1 %v359_v2  ;;  %v347_v5 = vld [vmem:[#allocation6 + $0x20] sm:$0xff]  ;;  %v346_v6 = vld [vmem:[#allocation6 + $0x18] sm:$0xff]  ;;  %v345_v7 = vld [vmem:[#allocation6 + $0x10] sm:$0xff] }
  0x12   :  { %v344_v8 = vld [vmem:[#allocation6 + $0x8] sm:$0xff]  ;;  %v343_v9 = vld [vmem:[#allocation6] sm:$0xff]  ;;  %v72_v10 = vld [vmem:[#allocation3] sm:$0xff] }
  0x13   :  { %v73_v11 = vld [vmem:[#allocation3 + $0x8] sm:$0xff]  ;;  %v357_v13 = vld [vmem:[#allocation8 + $0x28] sm:$0xff]  ;;  %v356_v14 = vld [vmem:[#allocation8 + $0x20] sm:$0xff] }
  0x14   :  { %144 = vmatpush.bf16.msra.mxu0 %v349_v1  ;;  %v74_v12 = vpack.c.bf16 %v73_v11, %v72_v10  ;;  %v355_v15 = vld [vmem:[#allocation8 + $0x18] sm:$0xff]  ;;  %v354_v16 = vld [vmem:[#allocation8 + $0x10] sm:$0xff]  ;;  %v353_v17 = vld [vmem:[#allocation8 + $0x8] sm:$0xff] }
  0x15   :  { %240 = vmatpush.bf16.msra.mxu1 %v358_v3  ;;  %v352_v18 = vld [vmem:[#allocation8] sm:$0xff]  ;;  %v373_v20 = vld [vmem:[%s541_s2] ss:$0 sm:$0xff] }
  0x16   :  { %v374_v28 = vld [vmem:[%s543_s4] ss:$0 sm:$0xff] }
  0x18   :  { %145 = vmatpush.bf16.msra.mxu0 %v348_v4 }
  0x19   :  { %241 = vmatpush.bf16.msra.mxu1 %v357_v13 }
  0x1c   :  { %146 = vmatpush.bf16.msra.mxu0 %v347_v5 }
  0x1d   :  { %242 = vmatpush.bf16.msra.mxu1 %v356_v14 }
  0x20   :  { %147 = vmatpush.bf16.msra.mxu0 %v346_v6 }
  0x21   :  { %243 = vmatpush.bf16.msra.mxu1 %v355_v15 }
  0x24   :  { %148 = vmatpush.bf16.msra.mxu0 %v345_v7 }
  0x25   :  { %244 = vmatpush.bf16.msra.mxu1 %v354_v16 }
  0x28   :  { %149 = vmatpush.bf16.msra.mxu0 %v344_v8 }
  0x29   :  { %245 = vmatpush.bf16.msra.mxu1 %v353_v17 }
  0x2c   :  { %150 = vmatpush.bf16.msra.mxu0 %v343_v9 }
  0x2d   :  { %246 = vmatpush.bf16.msra.mxu1 %v352_v18 }
  0x2f   :  { %151 = vmatmul.bf16.vlgmr.msra.gmra.mxu0 %v74_v12 }
  0xac   :  { %v152_v19 = vpop.f32.mrf.mxu0 }
  0xad   :  { %v153_v21 = vadd.f32 %v373_v20, %v152_v19 }
  0xaf   :  { %v157_v24 = vmax.f32 %v153_v21, 0.0 }
  0xb4   :  { %v154_v22 = vpop.f32.mrf.mxu0 }
  0xb5   :  { %v155_v23 = vadd.f32 %v373_v20, %v154_v22 }
  0xb7   :  { %v158_v25 = vmax.f32 %v155_v23, 0.0 }
  0xb9   :  { %v363_v26 = vpack.c.bf16 %v158_v25, %v157_v24 }
  0xbb   :  { %364 = vst [vmem:[#allocation2] sm:$0xff] %v363_v26  }
  0xc2   :  { %v351_v27 = vld [vmem:[#allocation2] sm:$0xff] }
  0xc3   :  { %247 = vmatmul.bf16.vlgmr.msra.gmra.mxu1 %v351_v27 }
 0x140   :  { %v248_v29 = vpop.f32.mrf.mxu1 }
 0x141   :  { %v249_v30 = vadd.f32 %v374_v28, %v248_v29 }
 0x143   :  { %253 = vst [vmem:[#allocation9] sm:$0xff] %v249_v30 }
 0x148   :  { %v250_v31 = vpop.f32.mrf.mxu1 }
 0x149   :  { %v251_v32 = vadd.f32 %v374_v28, %v250_v31 }
 0x14b   :  { %254 = vst [vmem:[#allocation9 + $0x8] sm:$0xff] %v251_v32 }
 0x14c   :  { %267 = dma.vmem_to_hbm [thread:$0]  %s260_s14, 256, %s262_s16, [#allocation5], %s481_s30, %s481_s30, %s482_s6  }
 0x14d   :  { %475 = dma.done.wait [#allocation5], 256  }
 0x14e   :  { %476 = vsyncadd [#allocation5], 4294967040 }
 0x14f   :  { %272 = vsyncpa [#allocation4], 1 }
 0x150   :  { %273 = vsyncpa [#allocation7], 1 }
 0x151   :  { %274 = vsyncpa [#allocation5], 1 }

</bundles_post_ra>
